<compile_context>
chip_gen: v7x
topology: tpu7x:2x2x1
jax: 0.10.0
libtpu: 0.0.40
codegen_flags: <defaults>
</compile_context>

<pallas_src>
import functools

import jax
import jax.numpy as jnp
from jax.experimental import pallas as pl
from jax.experimental.pallas import tpu as pltpu


_TARGET_DMA_BYTES = 8 << 20     # aim for ~8 MiB per DMA descriptor
_MAX_DMA_DESCRIPTORS = 8        # cap on in-flight DMAs (and semaphores)


def _leading_axis_chunks(d0, total_bytes):
    """Split the leading axis into a few roughly equal chunks (static sizes)."""
    want = max(1, -(-total_bytes // _TARGET_DMA_BYTES))   # cdiv
    n_chunks = int(min(d0, want, _MAX_DMA_DESCRIPTORS))
    base = d0 // n_chunks
    rem = d0 % n_chunks
    return [base + (1 if i < rem else 0) for i in range(n_chunks)]


def _make_dma_copy_kernel(chunk_sizes):
    """Kernel that copies the input HBM ref to the output HBM ref via DMA.

    All chunk starts/sizes are static Python ints (shapes are known at trace
    time), so each chunk gets its own DMA descriptor; all are issued before any
    wait so the DMA engine overlaps them.
    """
    starts = []
    s = 0
    for c in chunk_sizes:
        starts.append(s)
        s += c

    def kernel(x_hbm, o_hbm, sems):
        copies = []
        for i, (st, sz) in enumerate(zip(starts, chunk_sizes)):
            cp = pltpu.make_async_copy(
                x_hbm.at[pl.ds(st, sz)],
                o_hbm.at[pl.ds(st, sz)],
                sems.at[i],
            )
            cp.start()
            copies.append(cp)
        for cp in copies:
            cp.wait()

    return kernel


@jax.jit
def _pass_through_pallas(x):
    """Identity routed through a chunked HBM->HBM DMA copy (Pallas kernel)."""
    if x.size == 0:
        return x

    # 0-d guard: DMA wants at least one axis. Reshapes are free under jit.
    xin = x if x.ndim >= 1 else x.reshape(1)
    shape = xin.shape
    itemsize = jnp.dtype(xin.dtype).itemsize
    total_bytes = int(xin.size) * int(itemsize)

    chunk_sizes = _leading_axis_chunks(shape[0], total_bytes)
    kernel = _make_dma_copy_kernel(chunk_sizes)

    out = pl.pallas_call(
        kernel,
        out_shape=jax.ShapeDtypeStruct(shape, xin.dtype),
        in_specs=[pl.BlockSpec(memory_space=pl.ANY)],
        out_specs=pl.BlockSpec(memory_space=pl.ANY),
        scratch_shapes=[pltpu.SemaphoreType.DMA((len(chunk_sizes),))],
        compiler_params=pltpu.CompilerParams(has_side_effects=True),
        cost_estimate=pl.CostEstimate(
            flops=0, transcendentals=0, bytes_accessed=2 * total_bytes
        ),
    )(xin)

    return out if x.ndim >= 1 else out.reshape(())


def pass_through(x, use_kernel=False):
    """Identity forward pass of PassThrough.

    By default returns x directly (zero HBM traffic — the true optimum for an
    identity op). Set use_kernel=True to route the data through the Pallas
    HBM->HBM DMA copy kernel (debug / benchmarking path).
    """
    if not use_kernel:
        return x
    return _pass_through_pallas(x)


class PassThroughPallas:
    """JAX/Pallas counterpart of the PyTorch PassThrough module."""

    def __init__(self, parent_name="", debug=False, use_pallas_kernel=False):
        self.parent_name = parent_name
        self.debug = debug
        self.use_pallas_kernel = use_pallas_kernel
        # No parameters: the PyTorch module's __init__ registers nothing.

    def encode(self, x):
        return (pass_through(x, use_kernel=self.use_pallas_kernel), None)

    def decode(self, x, dims):
        return pass_through(x, use_kernel=self.use_pallas_kernel)

    def forward(self, x):
        return pass_through(x, use_kernel=self.use_pallas_kernel)

    def __call__(self, x):
        return self.forward(x)

    def get_name(self):
        if self.parent_name != "":
            return "{} - PassThrough".format(self.parent_name)
        return "PassThrough"

    @staticmethod
    def get_static_name():
        return "PassThrough"


if __name__ == "__main__":
    key = jax.random.PRNGKey(0)
    # NCHW input, small shapes (batch=2, channels=4, spatial=16x16).
    x = jax.random.normal(key, (2, 4, 16, 16), dtype=jnp.float32)

    # --- Kernel path: exercise the Pallas DMA copy kernel explicitly. ---
    module = PassThroughPallas(parent_name="test", use_pallas_kernel=True)

    y = module(x)
    y = jax.block_until_ready(y)
    assert y.shape == x.shape and y.dtype == x.dtype
    assert bool(jnp.all(y == x))

    # encode / decode round-trip also identity.
    z, extra = module.encode(x)
    z = jax.block_until_ready(z)
    assert extra is None
    assert bool(jnp.all(jax.block_until_ready(module.decode(z, None)) == x))

    # Non-lane-multiple, sub-32-bit dtype case: no padding needed anymore,
    # the DMA copies the exact shape.
    xb = jax.random.normal(jax.random.PRNGKey(1), (3, 5, 7, 9), dtype=jnp.bfloat16)
    yb = jax.block_until_ready(pass_through(xb, use_kernel=True))
    assert yb.shape == xb.shape and yb.dtype == xb.dtype
    assert bool(jnp.all(yb == xb))

    # --- Fast path (default): identity with zero HBM traffic. ---
    fast = PassThroughPallas(parent_name="test")
    yf = jax.block_until_ready(fast(x))
    assert bool(jnp.all(yf == x))

    print("KERNEL_OK")
</pallas_src>

<mosaic_0001>
module attributes {stable_mosaic.version = 11 : i64} {
  func.func @kernel(%arg0: memref<2x4x16x16xf32, #tpu.memory_space<any>>, %arg1: memref<2x4x16x16xf32, #tpu.memory_space<any>>, %arg2: memref<1x!tpu.dma_semaphore, #tpu.memory_space<semaphore_mem>>) attributes {dimension_semantics = [], scalar_prefetch = 0 : i64, scratch_operands = 1 : i64, tpu.core_type = #tpu.core_type<tc>} {
    %c0_i32 = arith.constant 0 : i32
    %c0_i32_0 = arith.constant 0 : i32
    %c0_i32_1 = arith.constant 0 : i32
    %c0_i32_2 = arith.constant 0 : i32
    %c0_i32_3 = arith.constant 0 : i32
    %0 = tpu.memref_slice %arg0[%c0_i32_0, %c0_i32_1, %c0_i32_2, %c0_i32_3] : memref<2x4x16x16xf32, #tpu.memory_space<any>> -> memref<2x4x16x16xf32, #tpu.memory_space<any>>
    %c0_i32_4 = arith.constant 0 : i32
    %c0_i32_5 = arith.constant 0 : i32
    %c0_i32_6 = arith.constant 0 : i32
    %c0_i32_7 = arith.constant 0 : i32
    %1 = tpu.memref_slice %arg1[%c0_i32_4, %c0_i32_5, %c0_i32_6, %c0_i32_7] : memref<2x4x16x16xf32, #tpu.memory_space<any>> -> memref<2x4x16x16xf32, #tpu.memory_space<any>>
    %2 = tpu.memref_slice %arg2[%c0_i32] : memref<1x!tpu.dma_semaphore, #tpu.memory_space<semaphore_mem>> -> memref<1x!tpu.dma_semaphore, #tpu.memory_space<semaphore_mem>>
    %3 = tpu.memref_squeeze %2 : memref<1x!tpu.dma_semaphore, #tpu.memory_space<semaphore_mem>> -> memref<!tpu.dma_semaphore, #tpu.memory_space<semaphore_mem>>
    tpu.enqueue_dma source(%0 : memref<2x4x16x16xf32, #tpu.memory_space<any>>) target(%1 : memref<2x4x16x16xf32, #tpu.memory_space<any>>) target_semaphore(%3 : memref<!tpu.dma_semaphore, #tpu.memory_space<semaphore_mem>>)
    %c0_i32_8 = arith.constant 0 : i32
    %c0_i32_9 = arith.constant 0 : i32
    %c0_i32_10 = arith.constant 0 : i32
    %c0_i32_11 = arith.constant 0 : i32
    %c0_i32_12 = arith.constant 0 : i32
    %4 = tpu.memref_slice %arg0[%c0_i32_9, %c0_i32_10, %c0_i32_11, %c0_i32_12] : memref<2x4x16x16xf32, #tpu.memory_space<any>> -> memref<2x4x16x16xf32, #tpu.memory_space<any>>
    %c0_i32_13 = arith.constant 0 : i32
    %c0_i32_14 = arith.constant 0 : i32
    %c0_i32_15 = arith.constant 0 : i32
    %c0_i32_16 = arith.constant 0 : i32
    %5 = tpu.memref_slice %arg1[%c0_i32_13, %c0_i32_14, %c0_i32_15, %c0_i32_16] : memref<2x4x16x16xf32, #tpu.memory_space<any>> -> memref<2x4x16x16xf32, #tpu.memory_space<any>>
    %6 = tpu.memref_slice %arg2[%c0_i32_8] : memref<1x!tpu.dma_semaphore, #tpu.memory_space<semaphore_mem>> -> memref<1x!tpu.dma_semaphore, #tpu.memory_space<semaphore_mem>>
    %7 = tpu.memref_squeeze %6 : memref<1x!tpu.dma_semaphore, #tpu.memory_space<semaphore_mem>> -> memref<!tpu.dma_semaphore, #tpu.memory_space<semaphore_mem>>
    tpu.wait_dma2 semaphore(%7 : memref<!tpu.dma_semaphore, #tpu.memory_space<semaphore_mem>>) src(%4 : memref<2x4x16x16xf32, #tpu.memory_space<any>>) dst(%5 : memref<2x4x16x16xf32, #tpu.memory_space<any>>)
    return
  }
}

</mosaic_0001>

<bundles_post_ra>
// kernel: _pass_through_pallas.1
= control target key start
LH: loop header
LB: loop body
LE: loop exit
PB: predicated region body
PF: predicated region fallthrough
CT: control target
= control target key end

     0   :  { %s36_s6 = smov [#allocation2]   ;;  %s37_s7 = smov [#allocation3]   ;;  %s55_s0 = inlined_call_operand.hbm [shape: f32[2,4,16,16], index: 0, kind: input, shape index: {}]   ;;  %s56_s1 = inlined_call_operand.hbm [shape: f32[2,4,16,16], index: 1, kind: output, shape index: {}]  }
   0x1   :  { %s38_s8 = smov 0  }
   0x2   :  { %18 = dma.general %s55_s0, 2048, %s56_s1, %s36_s6, %s37_s7, [#allocation4], %s38_s8, 0  }
   0x3   :  { %34 = dma.done.wait [#allocation2], 2048 }
   0x4   :  { %35 = vsyncadd [#allocation2], 4294965248 }
   0x5   :  { %24 = vsyncmov [#allocation2] }
   0x8   :  { %s25_s13 = vpop.sfrf %24 }
   0x9   :  { %p30_p0 = scmp.ne.s32.totalorder %s25_s13, 0 }
   0xb   :  { %29 = shalt.err (%p30_p0)  }

</bundles_post_ra>
